<compile_context>
chip_gen: v5e
topology: v5e:2x2
jax: 0.10.0
libtpu: 0.0.40
codegen_flags: <defaults>
</compile_context>

<pallas_src>
import functools

import jax
import jax.numpy as jnp
from jax import lax
from jax.experimental import pallas as pl
from jax.experimental.pallas import tpu as pltpu


def _attn_kernel(x_ref, w_ref, b_ref, amask_ref, o_ref, qkv_ref, *,
                 head_dim, heads_per_group, q_tile):
    D = head_dim
    GD = heads_per_group * D
    TQ = q_tile
    T = x_ref.shape[1]
    qi = pl.program_id(2)

    # Fused QKV projection once per (b, g) group (qi is the innermost grid axis):
    # one MXU matmul with f32 accumulation + bias, cast to bf16 once into scratch.
    @pl.when(qi == 0)
    def _():
        qkv = jnp.dot(x_ref[0], w_ref[0],
                      preferred_element_type=jnp.float32) + b_ref[0]   # (T, 3*GD) f32
        qkv_ref[...] = qkv.astype(jnp.bfloat16)

    q_start = pl.multiple_of(qi * TQ, TQ)

    # Causal mask for this query tile + additive key mask.  Recomputed per step:
    # cheap VPU filler that hides under the MXU; no long-lived (T, T) tenant.
    row = lax.broadcasted_iota(jnp.int32, (TQ, T), 0) + qi * TQ
    col = lax.broadcasted_iota(jnp.int32, (TQ, T), 1)
    causal = col <= row
    amask = amask_ref[0]                                               # (1, T) f32

    for h in range(heads_per_group):                                   # static unroll
        lo = h * D
        q_h = qkv_ref[pl.ds(q_start, TQ), lo:lo + D]                   # (TQ, D) bf16 (pre-scaled)
        k_h = qkv_ref[:, GD + lo:GD + lo + D]                          # (T, D)  bf16
        v_h = qkv_ref[:, 2 * GD + lo:2 * GD + lo + D]                  # (T, D)  bf16

        # QK^T without an explicit transpose: contract the last dims of q and k.
        s = lax.dot_general(q_h, k_h, (((1,), (1,)), ((), ())),
                            preferred_element_type=jnp.float32)        # (TQ, T) f32
        s = jnp.where(causal, s + amask, -1e30)                        # finite fill, NaN-safe

        m = jnp.max(s, axis=-1, keepdims=True)                         # f32 softmax
        e = jnp.exp(s - m)                                             # (TQ, T)
        denom = jnp.sum(e, axis=-1, keepdims=True)                     # (TQ, 1)

        o_h = jnp.dot(e.astype(jnp.bfloat16), v_h,
                      preferred_element_type=jnp.float32)              # (TQ, D)
        # Deferred normalization on the (TQ, D) output via the EUP reciprocal.
        o_h = o_h * pl.reciprocal(denom, approx=True)
        # Direct per-head store: no concatenate, no accumulated live ranges.
        o_ref[0, :, lo:lo + D] = o_h.astype(o_ref.dtype)


def _heads_per_group(num_heads, head_dim):
    # Smallest divisor of H whose group width (hpg*D) is a multiple of 128 lanes;
    # otherwise all heads in one group (the output block then spans the full C dim,
    # which satisfies the (8,128) rule via the full-dim exemption).
    for hpg in range(1, num_heads + 1):
        if num_heads % hpg == 0 and (hpg * head_dim) % 128 == 0:
            return hpg
    return num_heads


def _q_tile(seq_len, max_tile=256):
    # Largest divisor of T that is a multiple of 8 and <= max_tile; fall back to the
    # full sequence when T is small or no aligned divisor exists (full-dim exemption).
    if seq_len <= max_tile:
        return seq_len
    for tq in range(max_tile, 7, -8):
        if seq_len % tq == 0:
            return tq
    return seq_len


def causal_self_attention(x, wq, wk, wv, bq, bk, bv, attention_mask, num_heads):
    """x: [B, T, C]; w*: [C, C] in (in, out) convention; b*: [C];
    attention_mask: [B, 1, 1, T] additive; returns [B, T, C]."""
    B, T, C = x.shape
    H = num_heads
    D = C // H
    scale = float(D) ** -0.5

    hpg = _heads_per_group(H, D)
    G = H // hpg
    GD = hpg * D
    TQ = _q_tile(T)
    NQ = T // TQ

    def pack_w(w):
        return w.reshape(C, G, GD).transpose(1, 0, 2)        # (G, C, GD)

    def pack_b(b):
        return b.reshape(G, 1, GD)                           # (G, 1, GD)

    # Fold the softmax scale into the query projection (f32, pre-cast) and fuse the
    # three projections into one bf16 weight / f32 bias tensor per head group.
    w_qkv = jnp.concatenate([pack_w(wq * scale), pack_w(wk), pack_w(wv)],
                            axis=-1).astype(jnp.bfloat16)    # (G, C, 3*GD)
    b_qkv = jnp.concatenate([pack_b(bq * scale), pack_b(bk), pack_b(bv)],
                            axis=-1).astype(jnp.float32)     # (G, 1, 3*GD)
    amask = attention_mask.reshape(B, 1, T).astype(jnp.float32)
    x_bf = x.astype(jnp.bfloat16)                            # halve x HBM/VMEM traffic

    out_itemsize = jnp.dtype(x.dtype).itemsize
    vmem_est = (2 * T * C * 2                 # x (double-buffered, bf16)
                + 2 * C * 3 * GD * 2          # fused weights (bf16)
                + 2 * 3 * GD * 4 + 2 * T * 4  # bias + mask
                + 2 * TQ * GD * out_itemsize  # output block
                + T * 3 * GD * 2              # persistent QKV scratch (bf16)
                + 6 * TQ * T * 4)             # score/softmax temporaries (margin)
    vmem_limit = int(min(max(2 * vmem_est, 32 * 1024 * 1024), 100 * 1024 * 1024))

    kernel = functools.partial(_attn_kernel, head_dim=D, heads_per_group=hpg,
                               q_tile=TQ)

    # Grid order (B, G, NQ) suits prefill-style (x-dominated) traffic.  For
    # weight-dominated decode-like shapes, swap to (G, B, ...) so weights stay
    # resident across the batch.
    out = pl.pallas_call(
        kernel,
        out_shape=jax.ShapeDtypeStruct((B, T, C), x.dtype),
        grid_spec=pltpu.PrefetchScalarGridSpec(
            num_scalar_prefetch=0,
            grid=(B, G, NQ),
            in_specs=[
                pl.BlockSpec((1, T, C), lambda b, g, q: (b, 0, 0)),        # x (revisited over g,q)
                pl.BlockSpec((1, C, 3 * GD), lambda b, g, q: (g, 0, 0)),   # fused QKV weights
                pl.BlockSpec((1, 1, 3 * GD), lambda b, g, q: (g, 0, 0)),   # fused QKV bias
                pl.BlockSpec((1, 1, T), lambda b, g, q: (b, 0, 0)),        # additive mask
            ],
            out_specs=pl.BlockSpec((1, TQ, GD), lambda b, g, q: (b, q, g)),  # lane-dense slab
            scratch_shapes=[pltpu.VMEM((T, 3 * GD), jnp.bfloat16)],          # persistent QKV
        ),
        compiler_params=pltpu.CompilerParams(
            dimension_semantics=("parallel", "parallel", "arbitrary"),
            vmem_limit_bytes=vmem_limit),
    )(x_bf, w_qkv, b_qkv, amask)

    # Output already in 'b t (h d)' layout — no post-kernel transpose.
    return out


def _reference(x, wq, wk, wv, bq, bk, bv, attention_mask, num_heads):
    B, T, C = x.shape
    H = num_heads
    D = C // H

    def proj(w, b):
        p = x @ w + b
        return p.reshape(B, T, H, D).transpose(0, 2, 1, 3)   # (B, H, T, D)

    q, k, v = proj(wq, bq), proj(wk, bk), proj(wv, bv)
    s = jnp.einsum('bhtd,bhsd->bhts', q, k) * (float(D) ** -0.5)
    causal = jnp.triu(jnp.ones((T, T), dtype=bool), k=1)
    s = jnp.where(causal[None, None], -jnp.inf, s)
    s = s + attention_mask                                   # (B, 1, 1, T)
    p = jax.nn.softmax(s, axis=-1)
    o = jnp.einsum('bhts,bhsd->bhtd', p, v)
    return o.transpose(0, 2, 1, 3).reshape(B, T, C)


if __name__ == "__main__":
    B, T, C, H = 2, 8, 32, 4  # batch, seq, hidden, heads  (head dim = 8)

    key = jax.random.PRNGKey(0)
    kx, kq, kk, kv, kbq, kbk, kbv, km = jax.random.split(key, 8)

    x = jax.random.normal(kx, (B, T, C), dtype=jnp.float32)
    # Linear params in (in, out) convention (equivalent to PyTorch W^T).
    wq = jax.random.normal(kq, (C, C), dtype=jnp.float32) * 0.05
    wk = jax.random.normal(kk, (C, C), dtype=jnp.float32) * 0.05
    wv = jax.random.normal(kv, (C, C), dtype=jnp.float32) * 0.05
    bq = jax.random.normal(kbq, (C,), dtype=jnp.float32) * 0.05
    bk = jax.random.normal(kbk, (C,), dtype=jnp.float32) * 0.05
    bv = jax.random.normal(kbv, (C,), dtype=jnp.float32) * 0.05
    # Additive attention mask [B, 1, 1, T]: randomly hide ~20% of key positions.
    attention_mask = jnp.where(
        jax.random.uniform(km, (B, 1, 1, T)) > 0.8, -1e9, 0.0
    ).astype(jnp.float32)

    out = causal_self_attention(x, wq, wk, wv, bq, bk, bv, attention_mask, H)
    out = jax.block_until_ready(out)

    ref = _reference(x, wq, wk, wv, bq, bk, bv, attention_mask, H)
    assert out.shape == (B, T, C)
    # bf16 matmul inputs + approximate reciprocal -> compare with relaxed tolerance.
    assert jnp.allclose(out, ref, atol=2e-2, rtol=2e-2), "mismatch vs reference"

    print("KERNEL_OK")
</pallas_src>

<mosaic_0001>
module attributes {stable_mosaic.version = 11 : i64} {
  func.func @_attn_kernel(%arg0: i32, %arg1: i32, %arg2: i32, %arg3: memref<1x8x32xbf16, #tpu.memory_space<vmem>>, %arg4: memref<1x32x96xbf16, #tpu.memory_space<vmem>>, %arg5: memref<1x1x96xf32, #tpu.memory_space<vmem>>, %arg6: memref<1x1x8xf32, #tpu.memory_space<vmem>>, %arg7: memref<1x8x32xf32, #tpu.memory_space<vmem>>, %arg8: memref<8x96xbf16, #tpu.memory_space<vmem>>) attributes {dimension_semantics = [#tpu.dimension_semantics<parallel>, #tpu.dimension_semantics<parallel>, #tpu.dimension_semantics<arbitrary>], iteration_bounds = array<i64: 2, 1, 1>, scalar_prefetch = 0 : i64, scratch_operands = 1 : i64, tpu.core_type = #tpu.core_type<tc>, window_params = [{transform_indices = @transform_0, window_bounds = array<i64: 1, 8, 32>}, {transform_indices = @transform_1, window_bounds = array<i64: 1, 32, 96>}, {transform_indices = @transform_2, window_bounds = array<i64: 1, 1, 96>}, {transform_indices = @transform_3, window_bounds = array<i64: 1, 1, 8>}, {transform_indices = @transform_4, window_bounds = array<i64: 1, 8, 32>}]} {
    %c0_i32 = arith.constant 0 : i32
    %0 = arith.cmpi eq, %arg2, %c0_i32 : i32
    %1 = arith.extui %0 : i1 to i32
    %c0_i32_0 = arith.constant 0 : i32
    %2 = arith.cmpi ne, %1, %c0_i32_0 : i32
    scf.if %2 {
      %c0_44 = arith.constant 0 : index
      %c0_45 = arith.constant 0 : index
      %c0_46 = arith.constant 0 : index
      %109 = vector.load %arg3[%c0_44, %c0_45, %c0_46] : memref<1x8x32xbf16, #tpu.memory_space<vmem>>, vector<1x8x32xbf16>
      %110 = vector.shape_cast %109 : vector<1x8x32xbf16> to vector<8x32xbf16>
      %c0_47 = arith.constant 0 : index
      %c0_48 = arith.constant 0 : index
      %c0_49 = arith.constant 0 : index
      %111 = vector.load %arg4[%c0_47, %c0_48, %c0_49] : memref<1x32x96xbf16, #tpu.memory_space<vmem>>, vector<1x32x96xbf16>
      %112 = vector.shape_cast %111 : vector<1x32x96xbf16> to vector<32x96xbf16>
      %cst_50 = arith.constant dense<0.000000e+00> : vector<8x96xf32>
      %113 = tpu.matmul %110, %112, %cst_50 {dimension_numbers = #tpu.dot_dimension_numbers<[1], [0], [0], [1], [0, 0, 1, 1], [], []>} : vector<8x32xbf16>, vector<32x96xbf16>, vector<8x96xf32> -> vector<8x96xf32>
      %c0_51 = arith.constant 0 : index
      %c0_52 = arith.constant 0 : index
      %c0_53 = arith.constant 0 : index
      %114 = vector.load %arg5[%c0_51, %c0_52, %c0_53] : memref<1x1x96xf32, #tpu.memory_space<vmem>>, vector<1x1x96xf32>
      %115 = vector.shape_cast %114 : vector<1x1x96xf32> to vector<1x96xf32>
      %116 = vector.broadcast %115 : vector<1x96xf32> to vector<8x96xf32>
      %117 = arith.addf %113, %116 : vector<8x96xf32>
      %118 = arith.truncf %117 : vector<8x96xf32> to vector<8x96xbf16>
      %c0_54 = arith.constant 0 : index
      %c0_55 = arith.constant 0 : index
      %119 = vector.load %arg8[%c0_54, %c0_55] : memref<8x96xbf16, #tpu.memory_space<vmem>>, vector<8x96xbf16>
      tpu.vector_store %arg8[%c0_54, %c0_55], %118 {strides = array<i32>} : memref<8x96xbf16, #tpu.memory_space<vmem>>, vector<8x96xbf16>,
    } else {
    }
    %c8_i32 = arith.constant 8 : i32
    %3 = arith.muli %arg2, %c8_i32 : i32
    %4 = tpu.assume_multiple %3, 8 : i32
    %5 = tpu.iota {dimensions = array<i32: 0>} : vector<8x8xi32>
    %c8_i32_1 = arith.constant 8 : i32
    %6 = arith.muli %arg2, %c8_i32_1 : i32
    %7 = vector.broadcast %6 : i32 to vector<8x8xi32>
    %8 = arith.addi %5, %7 : vector<8x8xi32>
    %9 = tpu.iota {dimensions = array<i32: 1>} : vector<8x8xi32>
    %10 = arith.cmpi sle, %9, %8 : vector<8x8xi32>
    %c0 = arith.constant 0 : index
    %c0_2 = arith.constant 0 : index
    %c0_3 = arith.constant 0 : index
    %11 = vector.load %arg6[%c0, %c0_2, %c0_3] : memref<1x1x8xf32, #tpu.memory_space<vmem>>, vector<1x1x8xf32>
    %12 = vector.shape_cast %11 : vector<1x1x8xf32> to vector<1x8xf32>
    %13 = arith.index_cast %4 : i32 to index
    %c0_4 = arith.constant 0 : index
    %14 = vector.load %arg8[%13, %c0_4] : memref<8x96xbf16, #tpu.memory_space<vmem>>, vector<8x8xbf16>
    %c0_5 = arith.constant 0 : index
    %c32 = arith.constant 32 : index
    %15 = vector.load %arg8[%c0_5, %c32] : memref<8x96xbf16, #tpu.memory_space<vmem>>, vector<8x8xbf16>
    %c0_6 = arith.constant 0 : index
    %c64 = arith.constant 64 : index
    %16 = vector.load %arg8[%c0_6, %c64] : memref<8x96xbf16, #tpu.memory_space<vmem>>, vector<8x8xbf16>
    %cst = arith.constant dense<0.000000e+00> : vector<8x8xf32>
    %17 = tpu.matmul %14, %15, %cst {dimension_numbers = #tpu.dot_dimension_numbers<[1], [1], [0], [0], [0, 0, 1, 0], [], []>} : vector<8x8xbf16>, vector<8x8xbf16>, vector<8x8xf32> -> vector<8x8xf32>
    %18 = vector.broadcast %12 : vector<1x8xf32> to vector<8x8xf32>
    %19 = arith.addf %17, %18 : vector<8x8xf32>
    %cst_7 = arith.constant -1.000000e+30 : f32
    %20 = vector.broadcast %cst_7 : f32 to vector<8x8xf32>
    %21 = arith.select %10, %19, %20 : vector<8x8xi1>, vector<8x8xf32>
    %cst_8 = arith.constant dense<0xFF800000> : vector<8xf32>
    %22 = vector.multi_reduction <maximumf>, %21, %cst_8 [1] : vector<8x8xf32> to vector<8xf32>
    %23 = vector.shape_cast %22 : vector<8xf32> to vector<8x1xf32>
    %24 = vector.broadcast %23 : vector<8x1xf32> to vector<8x8xf32>
    %25 = arith.subf %21, %24 : vector<8x8xf32>
    %26 = math.exp %25 : vector<8x8xf32>
    %cst_9 = arith.constant dense<0.000000e+00> : vector<8xf32>
    %27 = vector.multi_reduction <add>, %26, %cst_9 [1] : vector<8x8xf32> to vector<8xf32>
    %28 = vector.shape_cast %27 : vector<8xf32> to vector<8x1xf32>
    %29 = arith.truncf %26 : vector<8x8xf32> to vector<8x8xbf16>
    %cst_10 = arith.constant dense<0.000000e+00> : vector<8x8xf32>
    %30 = tpu.matmul %29, %16, %cst_10 {dimension_numbers = #tpu.dot_dimension_numbers<[1], [0], [0], [1], [0, 0, 1, 1], [], []>} : vector<8x8xbf16>, vector<8x8xbf16>, vector<8x8xf32> -> vector<8x8xf32>
    %31 = tpu.reciprocal %28 {approx = true} : vector<8x1xf32> -> vector<8x1xf32>
    %32 = vector.broadcast %31 : vector<8x1xf32> to vector<8x8xf32>
    %33 = arith.mulf %30, %32 : vector<8x8xf32>
    %c0_11 = arith.constant 0 : index
    %c0_12 = arith.constant 0 : index
    %c0_13 = arith.constant 0 : index
    %34 = vector.load %arg7[%c0_11, %c0_12, %c0_13] : memref<1x8x32xf32, #tpu.memory_space<vmem>>, vector<1x8x8xf32>
    %35 = vector.shape_cast %34 : vector<1x8x8xf32> to vector<8x8xf32>
    %36 = vector.shape_cast %33 : vector<8x8xf32> to vector<1x8x8xf32>
    tpu.vector_store %arg7[%c0_11, %c0_12, %c0_13], %36 {strides = array<i32>} : memref<1x8x32xf32, #tpu.memory_space<vmem>>, vector<1x8x8xf32>,
    %37 = arith.index_cast %4 : i32 to index
    %c8 = arith.constant 8 : index
    %38 = vector.load %arg8[%37, %c8] : memref<8x96xbf16, #tpu.memory_space<vmem>>, vector<8x8xbf16>
    %c0_14 = arith.constant 0 : index
    %c40 = arith.constant 40 : index
    %39 = vector.load %arg8[%c0_14, %c40] : memref<8x96xbf16, #tpu.memory_space<vmem>>, vector<8x8xbf16>
    %c0_15 = arith.constant 0 : index
    %c72 = arith.constant 72 : index
    %40 = vector.load %arg8[%c0_15, %c72] : memref<8x96xbf16, #tpu.memory_space<vmem>>, vector<8x8xbf16>
    %cst_16 = arith.constant dense<0.000000e+00> : vector<8x8xf32>
    %41 = tpu.matmul %38, %39, %cst_16 {dimension_numbers = #tpu.dot_dimension_numbers<[1], [1], [0], [0], [0, 0, 1, 0], [], []>} : vector<8x8xbf16>, vector<8x8xbf16>, vector<8x8xf32> -> vector<8x8xf32>
    %42 = vector.broadcast %12 : vector<1x8xf32> to vector<8x8xf32>
    %43 = arith.addf %41, %42 : vector<8x8xf32>
    %cst_17 = arith.constant -1.000000e+30 : f32
    %44 = vector.broadcast %cst_17 : f32 to vector<8x8xf32>
    %45 = arith.select %10, %43, %44 : vector<8x8xi1>, vector<8x8xf32>
    %cst_18 = arith.constant dense<0xFF800000> : vector<8xf32>
    %46 = vector.multi_reduction <maximumf>, %45, %cst_18 [1] : vector<8x8xf32> to vector<8xf32>
    %47 = vector.shape_cast %46 : vector<8xf32> to vector<8x1xf32>
    %48 = vector.broadcast %47 : vector<8x1xf32> to vector<8x8xf32>
    %49 = arith.subf %45, %48 : vector<8x8xf32>
    %50 = math.exp %49 : vector<8x8xf32>
    %cst_19 = arith.constant dense<0.000000e+00> : vector<8xf32>
    %51 = vector.multi_reduction <add>, %50, %cst_19 [1] : vector<8x8xf32> to vector<8xf32>
    %52 = vector.shape_cast %51 : vector<8xf32> to vector<8x1xf32>
    %53 = arith.truncf %50 : vector<8x8xf32> to vector<8x8xbf16>
    %cst_20 = arith.constant dense<0.000000e+00> : vector<8x8xf32>
    %54 = tpu.matmul %53, %40, %cst_20 {dimension_numbers = #tpu.dot_dimension_numbers<[1], [0], [0], [1], [0, 0, 1, 1], [], []>} : vector<8x8xbf16>, vector<8x8xbf16>, vector<8x8xf32> -> vector<8x8xf32>
    %55 = tpu.reciprocal %52 {approx = true} : vector<8x1xf32> -> vector<8x1xf32>
    %56 = vector.broadcast %55 : vector<8x1xf32> to vector<8x8xf32>
    %57 = arith.mulf %54, %56 : vector<8x8xf32>
    %c0_21 = arith.constant 0 : index
    %c0_22 = arith.constant 0 : index
    %c8_23 = arith.constant 8 : index
    %58 = vector.load %arg7[%c0_21, %c0_22, %c8_23] : memref<1x8x32xf32, #tpu.memory_space<vmem>>, vector<1x8x8xf32>
    %59 = vector.shape_cast %58 : vector<1x8x8xf32> to vector<8x8xf32>
    %60 = vector.shape_cast %57 : vector<8x8xf32> to vector<1x8x8xf32>
    tpu.vector_store %arg7[%c0_21, %c0_22, %c8_23], %60 {strides = array<i32>} : memref<1x8x32xf32, #tpu.memory_space<vmem>>, vector<1x8x8xf32>,
    %61 = arith.index_cast %4 : i32 to index
    %c16 = arith.constant 16 : index
    %62 = vector.load %arg8[%61, %c16] : memref<8x96xbf16, #tpu.memory_space<vmem>>, vector<8x8xbf16>
    %c0_24 = arith.constant 0 : index
    %c48 = arith.constant 48 : index
    %63 = vector.load %arg8[%c0_24, %c48] : memref<8x96xbf16, #tpu.memory_space<vmem>>, vector<8x8xbf16>
    %c0_25 = arith.constant 0 : index
    %c80 = arith.constant 80 : index
    %64 = vector.load %arg8[%c0_25, %c80] : memref<8x96xbf16, #tpu.memory_space<vmem>>, vector<8x8xbf16>
    %cst_26 = arith.constant dense<0.000000e+00> : vector<8x8xf32>
    %65 = tpu.matmul %62, %63, %cst_26 {dimension_numbers = #tpu.dot_dimension_numbers<[1], [1], [0], [0], [0, 0, 1, 0], [], []>} : vector<8x8xbf16>, vector<8x8xbf16>, vector<8x8xf32> -> vector<8x8xf32>
    %66 = vector.broadcast %12 : vector<1x8xf32> to vector<8x8xf32>
    %67 = arith.addf %65, %66 : vector<8x8xf32>
    %cst_27 = arith.constant -1.000000e+30 : f32
    %68 = vector.broadcast %cst_27 : f32 to vector<8x8xf32>
    %69 = arith.select %10, %67, %68 : vector<8x8xi1>, vector<8x8xf32>
    %cst_28 = arith.constant dense<0xFF800000> : vector<8xf32>
    %70 = vector.multi_reduction <maximumf>, %69, %cst_28 [1] : vector<8x8xf32> to vector<8xf32>
    %71 = vector.shape_cast %70 : vector<8xf32> to vector<8x1xf32>
    %72 = vector.broadcast %71 : vector<8x1xf32> to vector<8x8xf32>
    %73 = arith.subf %69, %72 : vector<8x8xf32>
    %74 = math.exp %73 : vector<8x8xf32>
    %cst_29 = arith.constant dense<0.000000e+00> : vector<8xf32>
    %75 = vector.multi_reduction <add>, %74, %cst_29 [1] : vector<8x8xf32> to vector<8xf32>
    %76 = vector.shape_cast %75 : vector<8xf32> to vector<8x1xf32>
    %77 = arith.truncf %74 : vector<8x8xf32> to vector<8x8xbf16>
    %cst_30 = arith.constant dense<0.000000e+00> : vector<8x8xf32>
    %78 = tpu.matmul %77, %64, %cst_30 {dimension_numbers = #tpu.dot_dimension_numbers<[1], [0], [0], [1], [0, 0, 1, 1], [], []>} : vector<8x8xbf16>, vector<8x8xbf16>, vector<8x8xf32> -> vector<8x8xf32>
    %79 = tpu.reciprocal %76 {approx = true} : vector<8x1xf32> -> vector<8x1xf32>
    %80 = vector.broadcast %79 : vector<8x1xf32> to vector<8x8xf32>
    %81 = arith.mulf %78, %80 : vector<8x8xf32>
    %c0_31 = arith.constant 0 : index
    %c0_32 = arith.constant 0 : index
    %c16_33 = arith.constant 16 : index
    %82 = vector.load %arg7[%c0_31, %c0_32, %c16_33] : memref<1x8x32xf32, #tpu.memory_space<vmem>>, vector<1x8x8xf32>
    %83 = vector.shape_cast %82 : vector<1x8x8xf32> to vector<8x8xf32>
    %84 = vector.shape_cast %81 : vector<8x8xf32> to vector<1x8x8xf32>
    tpu.vector_store %arg7[%c0_31, %c0_32, %c16_33], %84 {strides = array<i32>} : memref<1x8x32xf32, #tpu.memory_space<vmem>>, vector<1x8x8xf32>,
    %85 = arith.index_cast %4 : i32 to index
    %c24 = arith.constant 24 : index
    %86 = vector.load %arg8[%85, %c24] : memref<8x96xbf16, #tpu.memory_space<vmem>>, vector<8x8xbf16>
    %c0_34 = arith.constant 0 : index
    %c56 = arith.constant 56 : index
    %87 = vector.load %arg8[%c0_34, %c56] : memref<8x96xbf16, #tpu.memory_space<vmem>>, vector<8x8xbf16>
    %c0_35 = arith.constant 0 : index
    %c88 = arith.constant 88 : index
    %88 = vector.load %arg8[%c0_35, %c88] : memref<8x96xbf16, #tpu.memory_space<vmem>>, vector<8x8xbf16>
    %cst_36 = arith.constant dense<0.000000e+00> : vector<8x8xf32>
    %89 = tpu.matmul %86, %87, %cst_36 {dimension_numbers = #tpu.dot_dimension_numbers<[1], [1], [0], [0], [0, 0, 1, 0], [], []>} : vector<8x8xbf16>, vector<8x8xbf16>, vector<8x8xf32> -> vector<8x8xf32>
    %90 = vector.broadcast %12 : vector<1x8xf32> to vector<8x8xf32>
    %91 = arith.addf %89, %90 : vector<8x8xf32>
    %cst_37 = arith.constant -1.000000e+30 : f32
    %92 = vector.broadcast %cst_37 : f32 to vector<8x8xf32>
    %93 = arith.select %10, %91, %92 : vector<8x8xi1>, vector<8x8xf32>
    %cst_38 = arith.constant dense<0xFF800000> : vector<8xf32>
    %94 = vector.multi_reduction <maximumf>, %93, %cst_38 [1] : vector<8x8xf32> to vector<8xf32>
    %95 = vector.shape_cast %94 : vector<8xf32> to vector<8x1xf32>
    %96 = vector.broadcast %95 : vector<8x1xf32> to vector<8x8xf32>
    %97 = arith.subf %93, %96 : vector<8x8xf32>
    %98 = math.exp %97 : vector<8x8xf32>
    %cst_39 = arith.constant dense<0.000000e+00> : vector<8xf32>
    %99 = vector.multi_reduction <add>, %98, %cst_39 [1] : vector<8x8xf32> to vector<8xf32>
    %100 = vector.shape_cast %99 : vector<8xf32> to vector<8x1xf32>
    %101 = arith.truncf %98 : vector<8x8xf32> to vector<8x8xbf16>
    %cst_40 = arith.constant dense<0.000000e+00> : vector<8x8xf32>
    %102 = tpu.matmul %101, %88, %cst_40 {dimension_numbers = #tpu.dot_dimension_numbers<[1], [0], [0], [1], [0, 0, 1, 1], [], []>} : vector<8x8xbf16>, vector<8x8xbf16>, vector<8x8xf32> -> vector<8x8xf32>
    %103 = tpu.reciprocal %100 {approx = true} : vector<8x1xf32> -> vector<8x1xf32>
    %104 = vector.broadcast %103 : vector<8x1xf32> to vector<8x8xf32>
    %105 = arith.mulf %102, %104 : vector<8x8xf32>
    %c0_41 = arith.constant 0 : index
    %c0_42 = arith.constant 0 : index
    %c24_43 = arith.constant 24 : index
    %106 = vector.load %arg7[%c0_41, %c0_42, %c24_43] : memref<1x8x32xf32, #tpu.memory_space<vmem>>, vector<1x8x8xf32>
    %107 = vector.shape_cast %106 : vector<1x8x8xf32> to vector<8x8xf32>
    %108 = vector.shape_cast %105 : vector<8x8xf32> to vector<1x8x8xf32>
    tpu.vector_store %arg7[%c0_41, %c0_42, %c24_43], %108 {strides = array<i32>} : memref<1x8x32xf32, #tpu.memory_space<vmem>>, vector<1x8x8xf32>,
    return
  }
  func.func @transform_0(%arg0: i32, %arg1: i32, %arg2: i32) -> (i32, i32, i32) {
    %c0_i32 = arith.constant 0 : i32
    %c0_i32_0 = arith.constant 0 : i32
    %c0_i32_1 = arith.constant 0 : i32
    return %arg0, %c0_i32, %c0_i32_0 : i32, i32, i32
  }
  func.func @transform_1(%arg0: i32, %arg1: i32, %arg2: i32) -> (i32, i32, i32) {
    %c0_i32 = arith.constant 0 : i32
    %c0_i32_0 = arith.constant 0 : i32
    %c0_i32_1 = arith.constant 0 : i32
    return %arg1, %c0_i32, %c0_i32_0 : i32, i32, i32
  }
  func.func @transform_2(%arg0: i32, %arg1: i32, %arg2: i32) -> (i32, i32, i32) {
    %c0_i32 = arith.constant 0 : i32
    %c0_i32_0 = arith.constant 0 : i32
    %c0_i32_1 = arith.constant 0 : i32
    return %arg1, %c0_i32, %c0_i32_0 : i32, i32, i32
  }
  func.func @transform_3(%arg0: i32, %arg1: i32, %arg2: i32) -> (i32, i32, i32) {
    %c0_i32 = arith.constant 0 : i32
    %c0_i32_0 = arith.constant 0 : i32
    %c0_i32_1 = arith.constant 0 : i32
    return %arg0, %c0_i32, %c0_i32_0 : i32, i32, i32
  }
  func.func @transform_4(%arg0: i32, %arg1: i32, %arg2: i32) -> (i32, i32, i32) {
    %c0_i32 = arith.constant 0 : i32
    return %arg0, %arg2, %arg1 : i32, i32, i32
  }
}

</mosaic_0001>

<bundles_post_ra>
// kernel: tpu_custom_call.1
= control target key start
LH: loop header
LB: loop body
LE: loop exit
PB: predicated region body
PF: predicated region fallthrough
CT: control target
= control target key end

     0   :  { %9 = vsyncpa [#allocation4], 0  ;;  %s1338_s0 = inlined_call_operand.hbm [shape: bf16[2,8,32], index: 0, kind: input, shape index: {}]   ;;  %s1339_s1 = inlined_call_operand.hbm [shape: bf16[1,32,96], index: 1, kind: input, shape index: {}]   ;;  %s1340_s2 = inlined_call_operand.hbm [shape: f32[1,1,96], index: 2, kind: input, shape index: {}]   ;;  %s1341_s3 = inlined_call_operand.vmem [shape: f32[2,1,8], index: 3, kind: input, shape index: {}]   ;;  %s1342_s4 = inlined_call_operand.hbm [shape: f32[2,8,32], index: 4, kind: output, shape index: {}]  }
   0x1   :  { %11 = vsyncpa [#allocation4 + $0x1], 0 }
   0x2   :  { %12 = vsyncpa [#allocation7], 0 }
   0x3   :  { %13 = vsyncpa [#allocation5], 0 }
   0x4   :  { %15 = vsyncpa [#allocation5 + $0x1], 0  ;;  %s1143_s15 = smov 0   ;;  %s1145_s16 = smov 0  }
   0x5   :  { %s1147_s17 = smov 0   ;;  %s1149_s18 = smov 0  }
   0x6   :  { %s1151_s19 = smov 0   ;;  %s1153_s20 = smov 0  }
   0x7 LB: > { %s769_s21 = sadd.s32 4294967295, %s1098_s20   ;;  %p771_p0 = scmp.ge.s32.totalorder %s1098_s20, 1  ;;  %s1098_s20 = sphi %s1153_s20, %s21_s20   ;;  %s1094_s19 = sphi %s1151_s19, %s1352_s19   ;;  %s1090_s18 = sphi %s1149_s18, %s1351_s18   ;;  %s1086_s17 = sphi %s1147_s17, %s1350_s17   ;;  %s1082_s16 = sphi %s1145_s16, %s1349_s16   ;;  %s1078_s15 = sphi %s1143_s15, %s1348_s15  }
   0x8   : > { %p1177_p1 = scmp.eq.s32.totalorder %s769_s21, 0  ;;  %p179_p2 = scmp.lt.s32.totalorder %s1098_s20, 3 }
   0x9   : > { %s193_s25 = sshll.u32 %s1339_s1, 4  ;;  %s1100_s27 = smov [#allocation6]   ;;  %s194_s25 = int_to_ptr.hbm [resolvable:$true] %s193_s25 }
   0xa   : > { %p1185_p3 = pnand %p771_p0, %p179_p2  ;;  %s195_s28 = sshll.u32 %s1100_s27, 4  ;;  %s196_s28 = int_to_ptr.vmem [resolvable:$true] %s195_s28 }
   0xb   : > { %p774_p6 = scmp.ge.s32.totalorder %s1098_s20, 2  ;;  %s209_s5 = sshll.u32 %s1340_s2, 4  ;;  %s210_s5 = int_to_ptr.hbm [resolvable:$true] %s209_s5 }
   0xc   : > { %p817_p4 = pneg %p1185_p3  ;;  %s1101_s6 = smov 64  }
   0xd   : > { %s1102_s7 = smov 4   ;;  %s1103_s8 = smov [#allocation8]  }
   0xe   : > { %p818_p5 = pnand %p817_p4, %p1177_p1  ;;  %s211_s9 = sshll.u32 %s1103_s8, 4  ;;  %s212_s9 = int_to_ptr.vmem [resolvable:$true] %s211_s9 }
   0xf   : > { %s40_s10 = sadd.s32 1, %s1094_s19  ;;  %s770_s11 = sadd.s32 4294967294, %s1098_s20  }
  0x10   : > { %820 = dma.hbm_to_vmem [thread:$0]  (!%p818_p5), %s194_s25, 256, %s196_s28, [#allocation7], %s1101_s6, %s1101_s6, %s1102_s7  }
  0x11   : > { %823 = dma.hbm_to_vmem [thread:$0]  (!%p818_p5), %s210_s5, 16, %s212_s9, [#allocation7]  }
  0x12   : > { %p42_p7 = scmp.ge.s32.totalorder %s40_s10, 2  ;;  %s47_s12 = sadd.s32 1, %s1086_s17 }
  0x13   : > { %p54_p8 = scmp.ne.s32.totalorder %s1086_s17, %s1082_s16  ;;  %p55_p9 = scmp.eq.s32.totalorder %s1098_s20, 0 }
  0x14   : > { %s1354_s10 = smov (%p42_p7, %s40_s10), 0  ;;  %p60_p10 = scmp.ne.s32.totalorder %s1082_s16, %s1078_s15 }
  0x15   : > { %s44_s13 = ssub.s32 %s1094_s19, %s1354_s10  ;;  %p166_p11 = scmp.eq.s32.totalorder %s769_s21, 1 }
  0x16   : > { %p45_p12 = scmp.eq.s32.totalorder %s44_s13, 0  ;;  %p1213_p13 = por %p1177_p1, %p60_p10 }
  0x17   : > { %p1217_p0 = por %p166_p11, %p54_p8  ;;  %p172_p2 = scmp.eq.s32.totalorder %s770_s11, 1 }
  0x18   : > { %s1222_s24 = scalar_select %p45_p12, %s1086_s17, %s47_s12  }
  0x19   : > { %p56_p4 = por %p55_p9, %p54_p8  ;;  %p1224_p5 = por %p172_p2, %p60_p10 }
  0x1a   : > { %s222_s27 = sand.u32 1, %s1086_s17   ;;  %s776_s21 = sshll.u32 %s1094_s19, 2 }
  0x1b   : > { %p834_p7 = scmp.lt.s32.totalorder %s1098_s20, 2  ;;  %s775_s28 = sshll.u32 %s222_s27, 2 }
  0x1c   : > { %s230_s5 = scalar_lea.hbm %s1338_s0, %s776_s21  ;;  %s226_s7 = scalar_lea.vmem [#allocation3], %s775_s28 }
  0x1d   : > { %s232_s6 = sshll.u32 %s230_s5, 4  ;;  %s234_s8 = sshll.u32 %s226_s7, 4  ;;  %s233_s6 = int_to_ptr.hbm [resolvable:$true] %s232_s6  ;;  %s235_s8 = int_to_ptr.vmem [resolvable:$true] %s234_s8 }
  0x1e   : > { %p825_p11 = pnand %p834_p7, %p56_p4  ;;  %s223_s9 = scalar_lea.sflag [#allocation4], %s222_s27 }
  0x1f   : > { %249 = sbr.rel (%p1185_p3) target bundleno = 857 (0x359), region = 36  ;;  %s1237_s11 = sand.u32 (!%p1185_p3), 1, %s1082_s16  }
  0x20   : > { %827 = dma.hbm_to_vmem [thread:$0]  (!%p825_p11), %s233_s6, 64, %s235_s8, %s223_s9  }
  0x21   : > { %s778_s12 = sshll.u32 (!%p1185_p3), %s1237_s11, 2  ;;  %s252_s13 = scalar_lea.sflag (!%p1185_p3), [#allocation4], %s1237_s11 }
  0x22   : > { %s255_s21 = scalar_lea.vmem (!%p1185_p3), [#allocation3], %s778_s12 }
  0x24   : > { %1065 = dma.done.wait (%p1213_p13), %s252_s13, 64  }
  0x25   : > { %1067 = vsyncadd (%p1213_p13), %s252_s13, 4294967232 }
  0x26   : > { %1069 = dma.done.wait (%p1177_p1), [#allocation7], 272  }
  0x27   : > { %1071 = vsyncadd (%p1177_p1), [#allocation7], 4294967024  ;;  %v804_v0 = vld [vmem:[#allocation6 + $0x8] sm:$0xff]  ;;  %v803_v1 = vld [vmem:[#allocation6] sm:$0xff]  ;;  %vm323_vm0 = vcmask 261120   ;;  %vm341_vm1 = vcmask 781312   ;;  %v344_v45 = vlaneseq }
  0x28   : > { %333 = vmatpush.bf16.msra.mxu0 %v804_v0  ;;  %v302_v2 = vld [vmem:[%s255_s21] sm:$0xf]  ;;  %v904_v3 = vld [vmem:[#allocation8] ss:$0 sm:$0xff]  ;;  %s1104_s22 = smov 104   ;;  %s1105_s26 = smov 120  }
  0x29   : > { %s1106_s14 = smov 96   ;;  %s1107_s27 = smov 80   ;;  %vm366_vm2 = vcmask 64512   ;;  %vm402_vm3 = vcmask 1043456   ;;  %v345_v46 = vshrl.u32 %v344_v45, 7  ;;  %v349_v47 = vand.u32 127, %v344_v45 }
  0x2a   : > { %s1108_s28 = smov 72   ;;  %s1109_s29 = smov 88   ;;  %vm491_vm5 = vcmask 130112   ;;  %vm562_vm6 = vcmask 195712   ;;  %vm633_vm7 = vcmask 261312  }
  0x2b   : > { %s1110_s30 = smov 64   ;;  %s1111_s5 = smov 112   ;;  %vm350_vm4 = vcmp.le.s32.totalorder %v349_v47, %v345_v46 }
  0x2c   : > { %334 = vmatpush.bf16.msra.mxu0 %v803_v1  ;;  %p294_p1 = scmp.lt.s32.totalorder %s1090_s18, 1  ;;  %s1112_s7 = smov 56  }
  0x2d   : > { %s636_s13 = scalar_lea.sflag [#allocation5], %s1237_s11 }
  0x2e   : > { %s1257_s6 = scalar_select %p294_p1, %s1090_s18, 1 }
  0x2f   : > { %790 = vmatmul.msk.bf16.vlgmr.msra.gmra.mxu0 %vm323_vm0, %v302_v2 }
  0x30   : > { %s296_s12 = scalar_lea.vmem %s1341_s3, %s1257_s6 }
  0x31   : > { %v905_v48 = vld [vmem:[%s296_s12] ss:$0 sm:$0xff] }
  0xac   : > { %v336_v4 = vpop.f32.mrf.mxu0 }
  0xad   : > { %v337_v5 = vadd.f32 %v904_v3, %v336_v4 }
  0xaf   : > { %v340_v6 = vpack.c.bf16 %v337_v5, %v337_v5 }
  0xb1   : > { %342 = vst.msk [vmem:[#allocation2] sm:$0xf] %vm341_vm1, %v340_v6 }
  0xb4   : > { %v338_v7 = vpop.f32.mrf.mxu0 }
  0xb8   : > { %v564_v8 = vld [vmem:[#allocation2] sm:$0xf] }
  0xb9   : > { %v422_v9 = vld [vmem:[#allocation2] sm:$0xf]  ;;  %v567_v11 = vunpack.c.l.b16 %v564_v8 }
  0xba   : > { %v357_v10 = vld [vmem:[#allocation2] sm:$0xf]  ;;  %v425_v12 = vunpack.c.l.b16 %v422_v9 }
  0xbb   : > { %v362_v13 = vunpack.c.l.b16 %v357_v10  ;;  %v568_v14 = vpack.c.b16 %v567_v11, %v567_v11  ;;  %v494_v17 = vld [vmem:[#allocation2] sm:$0xf] }
  0xbc   : > { %v426_v15 = vpack.c.b16 %v425_v12, %v425_v12  ;;  %v565_v18 = vld [vmem:[#allocation2] sm:$0xf]  ;;  %v501_v20 = vunpack.c.l.b16 %v494_v17 }
  0xbd   : > { %v363_v16 = vpack.c.b16 %v362_v13, %v362_v13  ;;  %569 = vrot.lane.b32.xlu2 %v568_v14, %s1104_s22  ;;  %v423_v19 = vld [vmem:[#allocation2] sm:$0xf]  ;;  %v572_v21 = vunpack.c.l.b16 %v565_v18  ;;  %s1113_s22 = smov 48  }
  0xbe   : > { %427 = vrot.lane.b32.xlu1 %v426_v15, %s1105_s26  ;;  %v430_v22 = vunpack.c.l.b16 %v423_v19  ;;  %v1249_v23 = vpack.c.b16 %v501_v20, %v501_v20  ;;  %v493_v26 = vld [vmem:[#allocation2] sm:$0xf]  ;;  %s1114_s26 = smov 40  }
  0xbf   : > { %364 = vrot.lane.b32.xlu0 %v363_v16, %s1106_s14  ;;  %v1251_v24 = vpack.c.b16 %v572_v21, %v572_v21  ;;  %v496_v27 = vunpack.c.l.b16 %v493_v26  ;;  %v356_v41 = vld [vmem:[#allocation2] sm:$0xf]  ;;  %s781_s14 = sshll.u32 %s1237_s11, 3 }
  0xc0   : > { %v431_v25 = vpack.c.b16 %v430_v22, %v430_v22 }
  0xc1   : > { %v497_v28 = vpack.c.b16 %v496_v27, %v496_v27 }
  0xc5   : > { %503 = vrot.lane.b32.xlu2 %v1249_v23, %s1107_s27  ;;  %s1115_s27 = smov 8  }
  0xc6   : > { %574 = vrot.lane.b32.xlu1 %v1251_v24, %s1108_s28  ;;  %s1116_s28 = smov 16  }
  0xc7   : > { %432 = vrot.lane.b32.xlu0 %v431_v25, %s1109_s29  ;;  %s293_s29 = scalar_lea.vmem [#allocation9], %s781_s14  ;;  %s1032_s14 = scalar_lea.hbm %s1342_s4, 16 }
  0xc8   : > { %s650_s9 = sshll.u32 %s293_s29, 4  ;;  %s651_s9 = int_to_ptr.vmem [resolvable:$true] %s650_s9 }
  0xcd   : > { %397 = vrot.lane.b32.xlu2 %v363_v16, %s1110_s30  ;;  %s1117_s30 = smov 24  }
  0xcf   : > { %498 = vrot.lane.b32.xlu0 %v497_v28, %s1111_s5  ;;  %s800_s5 = sshll.u32 %s1090_s18, 3 }
  0xd0   : > { %s648_s8 = scalar_lea.hbm %s1342_s4, %s800_s5 }
  0xd1   : > { %s652_s12 = sshll.u32 %s648_s8, 4  ;;  %s653_s12 = int_to_ptr.hbm [resolvable:$true] %s652_s12 }
  0xd2   : > { %s1026_s21 = sshra.s32 %s653_s12, 4  ;;  %s1027_s21 = int_to_ptr.hbm [resolvable:$true] %s1026_s21 }
  0xd3   : > { %p1033_p10 = scmp.lt.s32.totalorder %s1027_s21, %s1342_s4 }
  0xd5   : > { %464 = vrot.lane.b32.xlu2 %v431_v25, %s1112_s7 }
 0x117   : > { %v570_v29 = vpop.permute.xlu2 %569 }
 0x11f   : > { %v504_v30 = vpop.permute.xlu2 %503 }
 0x120   : > { %v509_v31 = vsel %vm366_vm2, %v504_v30, 0 }
 0x121   : > { %518 = vmatpush.bf16.xpose.msrb.mxu0 %v509_v31 }
 0x127   : > { %v398_v32 = vpop.permute.xlu2 %397 }
 0x128   : > { %v404_v33 = vsel %vm402_vm3, %v398_v32, 0 }
 0x129   : > { %413 = vmatpush.bf16.msra.mxu2 %v404_v33 }
 0x12f   : > { %v465_v35 = vpop.permute.xlu2 %464 }
 0x130   : > { %v428_v34 = vpop.permute.xlu1 %427  ;;  %v470_v37 = vsel %vm402_vm3, %v465_v35, 0 }
 0x131   : > { %v365_v36 = vpop.permute.xlu0 %364  ;;  %479 = vmatpush.bf16.msrb.mxu2 %v470_v37 }
 0x132   : > { %v371_v38 = vsel %vm366_vm2, %v365_v36, 0 }
 0x133   : > { %380 = vmatpush.bf16.xpose.msra.mxu1 %v371_v38 }
 0x138   : > { %v575_v39 = vpop.permute.xlu1 %574 }
 0x139   : > { %v433_v40 = vpop.permute.xlu0 %432  ;;  %v580_v42 = vsel %vm366_vm2, %v575_v39, 0 }
 0x13a   : > { %791 = vmatmul.msk.bf16.vlgmr.msra.gmra.mxu1 %vm366_vm2, %v356_v41  ;;  %v438_v43 = vsel %vm366_vm2, %v433_v40, 0 }
 0x13b   : > { %447 = vmatpush.bf16.xpose.msra.mxu3 %v438_v43 }
 0x141   : > { %v499_v44 = vpop.permute.xlu0 %498 }
 0x142   : > { %793 = vmatmul.msk.bf16.vlgmr.msra.gmra.mxu3 %vm366_vm2, %v428_v34  ;;  %795 = vmatmul.msk.bf16.vlgmr.msrb.gmra.mxu0 %vm366_vm2, %v499_v44 }
 0x143   : > { %589 = vmatpush.bf16.xpose.msrb.mxu3 %v580_v42 }
 0x152   : > { %797 = vmatmul.msk.bf16.vlgmr.msrb.gmra.mxu3 %vm366_vm2, %v570_v29 }
 0x1b7   : > { %v382_v49 = vpop.f32.mrf.mxu1 }
 0x1b8   : > { %v383_v50 = vadd.f32 %v905_v48, %v382_v49 }
 0x1ba   : > { %v386_v51 = vsel %vm350_vm4, %v383_v50, -1e+30 }
 0x1bb   : > { %v387_v52 = vsel %vm366_vm2, %v386_v51, -inf }
 0x1bc   : > { %388 = vmax.xlane.f32.xlu1 %v387_v52 }
 0x1bf   : > { %v384_v53 = vpop.f32.mrf.mxu1  ;;  %v520_v54 = vpop.f32.mrf.mxu0 }
 0x1c0   : > { %v521_v55 = vadd.f32 %v905_v48, %v520_v54 }
 0x1c2   : > { %v524_v56 = vsel %vm350_vm4, %v521_v55, -1e+30 }
 0x1c3   : > { %v525_v57 = vsel %vm366_vm2, %v524_v56, -inf }
 0x1c4   : > { %526 = vmax.xlane.f32.xlu1 %v525_v57 }
 0x1c5   : > { %v449_v58 = vpop.f32.mrf.mxu3 }
 0x1c6   : > { %v450_v59 = vadd.f32 %v905_v48, %v449_v58 }
 0x1c7   : > { %v522_v60 = vpop.f32.mrf.mxu0 }
 0x1c8   : > { %v453_v61 = vsel %vm350_vm4, %v450_v59, -1e+30 }
 0x1c9   : > { %v454_v62 = vsel %vm366_vm2, %v453_v61, -inf }
 0x1ca   : > { %455 = vmax.xlane.f32.xlu0 %v454_v62 }
 0x1cd   : > { %v451_v63 = vpop.f32.mrf.mxu3 }
 0x1d5   : > { %v591_v0 = vpop.f32.mrf.mxu3 }
 0x1d6   : > { %v592_v1 = vadd.f32 %v905_v48, %v591_v0 }
 0x1d8   : > { %v595_v2 = vsel %vm350_vm4, %v592_v1, -1e+30 }
 0x1d9   : > { %v596_v3 = vsel %vm366_vm2, %v595_v2, -inf }
 0x1da   : > { %597 = vmax.xlane.f32.xlu2 %v596_v3 }
 0x1dd   : > { %v593_v4 = vpop.f32.mrf.mxu3  ;;  %535 = vrot.lane.b32.xlu1 %v1249_v23, %s1113_s22  ;;  %s1028_s22 = scalar_lea.hbm %s1027_s21, 8 }
 0x1de   : > { %606 = vrot.lane.b32.xlu0 %v1251_v24, %s1114_s26  ;;  %p1029_p3 = scmp.ne.s32.totalorder %s1027_s21, %s1028_s22  ;;  %p1034_p12 = scmp.lt.s32.totalorder %s1032_s14, %s1028_s22 }
 0x1e0   : > { %p1030_p8 = pnand %p1029_p3, %p1217_p0  ;;  %p1035_p13 = por %p1034_p12, %p1033_p10 }
 0x1e2   : > { %p1031_p9 = pneg %p1030_p8 }
 0x1e4   : > { %p1036_p2 = pnand %p1035_p13, %p1031_p9 }
 0x22f   : > { %v389_v5 = vpop.xlane.xlu1 %388 }
 0x230   : > { %v390_v6 = vsub.f32 %v386_v51, %v389_v5 }
 0x232   : > { %v391_v7 = vmul.f32 1.442695, %v390_v6 }
 0x234   : > { %906 = vpow2.f32 %v391_v7 }
 0x237   : > { %v527_v10 = vpop.xlane.xlu1 %526 }
 0x238   : > { %v528_v13 = vsub.f32 %v524_v56, %v527_v10 }
 0x23a   : > { %v907_v8 = vpop.eup %906  ;;  %v529_v15 = vmul.f32 1.442695, %v528_v13 }
 0x23b   : > { %v396_v9 = vpack.c.bf16 %v907_v8, %v907_v8  ;;  %v393_v31 = vsel %vm366_vm2, %v907_v8, 0.0 }
 0x23d   : > { %v456_v11 = vpop.xlane.xlu0 %455  ;;  %792 = vmatmul.msk.bf16.vlgmr.msra.gmra.mxu2 %vm366_vm2, %v396_v9 }
 0x23e   : > { %v457_v12 = vsub.f32 %v453_v61, %v456_v11 }
 0x240   : > { %v458_v14 = vmul.f32 1.442695, %v457_v12 }
 0x242   : > { %908 = vpow2.f32 %v458_v14 }
 0x243   : > { %910 = vpow2.f32 %v529_v15 }
 0x248   : > { %v909_v16 = vpop.eup %908 }
 0x249   : > { %v460_v17 = vsel %vm366_vm2, %v909_v16, 0.0  ;;  %v463_v18 = vpack.c.bf16 %v909_v16, %v909_v16  ;;  %v911_v20 = vpop.eup %910 }
 0x24a   : > { %461 = vadd.xlane.f32.xlu2 %v460_v17  ;;  %v531_v27 = vsel %vm366_vm2, %v911_v20, 0.0  ;;  %v534_v28 = vpack.c.bf16 %v911_v20, %v911_v20 }
 0x24d   : > { %v598_v19 = vpop.xlane.xlu2 %597  ;;  %794 = vmatmul.msk.bf16.vlgmr.msrb.gmra.mxu2 %vm366_vm2, %v463_v18 }
 0x24e   : > { %v599_v21 = vsub.f32 %v595_v2, %v598_v19 }
 0x24f   : > { %v536_v22 = vpop.permute.xlu1 %535 }
 0x250   : > { %v600_v23 = vmul.f32 1.442695, %v599_v21  ;;  %v607_v24 = vpop.permute.xlu0 %606  ;;  %v541_v25 = vsel %vm402_vm3, %v536_v22, 0 }
 0x251   : > { %v612_v26 = vsel %vm402_vm3, %v607_v24, 0  ;;  %550 = vmatpush.bf16.msrb.mxu1 %v541_v25 }
 0x252   : > { %912 = vpow2.f32 %v600_v23  ;;  %621 = vmatpush.bf16.msra.mxu2 %v612_v26  ;;  %532 = vadd.xlane.f32.xlu2 %v531_v27 }
 0x254   : > { %796 = vmatmul.msk.bf16.vlgmr.msrb.gmra.mxu1 %vm366_vm2, %v534_v28 }
 0x258   : > { %v913_v29 = vpop.eup %912 }
 0x259   : > { %v602_v30 = vsel %vm366_vm2, %v913_v29, 0.0  ;;  %v605_v32 = vpack.c.bf16 %v913_v29, %v913_v29 }
 0x25a   : > { %603 = vadd.xlane.f32.xlu0 %v602_v30  ;;  %394 = vadd.xlane.f32.xlu2 %v393_v31 }
 0x25d   : > { %798 = vmatmul.msk.bf16.vlgmr.msra.gmra.mxu2 %vm366_vm2, %v605_v32 }
 0x2bd   : > { %v462_v33 = vpop.xlane.xlu2 %461 }
 0x2be   : > { %914 = vrcp.f32 %v462_v33 }
 0x2c0   : > { %v415_v34 = vpop.f32.mrf.mxu2 }
 0x2c4   : > { %v915_v38 = vpop.eup %914 }
 0x2c5   : > { %v533_v35 = vpop.xlane.xlu2 %532 }
 0x2c6   : > { %916 = vrcp.f32 %v533_v35 }
 0x2c8   : > { %v417_v36 = vpop.f32.mrf.mxu2 }
 0x2cc   : > { %v917_v40 = vpop.eup %916 }
 0x2cd   : > { %v395_v37 = vpop.xlane.xlu2 %394  ;;  %v604_v46 = vpop.xlane.xlu0 %603 }
 0x2ce   : > { %918 = vrcp.f32 %v395_v37 }
 0x2cf   : > { %920 = vrcp.f32 %v604_v46 }
 0x2d0   : > { %v481_v39 = vpop.f32.mrf.mxu2 }
 0x2d1   : > { %v486_v41 = vmul.f32 %v915_v38, %v481_v39  ;;  %v552_v42 = vpop.f32.mrf.mxu1 }
 0x2d2   : > { %v557_v43 = vmul.f32 %v917_v40, %v552_v42 }
 0x2d3   : > { %488 = vrot.lane.b32.xlu1 %v486_v41, %s1115_s27 }
 0x2d4   : > { %559 = vrot.lane.b32.xlu2 %v557_v43, %s1116_s28  ;;  %v919_v44 = vpop.eup %918 }
 0x2d5   : > { %v420_v45 = vmul.f32 %v919_v44, %v415_v34  ;;  %v921_v49 = vpop.eup %920 }
 0x2d7   : > { %421 = vst.msk [vmem:[%s293_s29] sm:$0xff] %vm366_vm2, %v420_v45 }
 0x2d8   : > { %v483_v47 = vpop.f32.mrf.mxu2 }
 0x2d9   : > { %v554_v48 = vpop.f32.mrf.mxu1 }
 0x2e0   : > { %v623_v50 = vpop.f32.mrf.mxu2 }
 0x2e1   : > { %v628_v51 = vmul.f32 %v921_v49, %v623_v50 }
 0x2e3   : > { %630 = vrot.lane.b32.xlu1 %v628_v51, %s1117_s30 }
 0x2e8   : > { %v625_v52 = vpop.f32.mrf.mxu2 }
 0x32e   : > { %v560_v54 = vpop.permute.xlu2 %559 }
 0x345   : > { %v489_v53 = vpop.permute.xlu1 %488 }
 0x346   : > { %492 = vst.msk [vmem:[%s293_s29] sm:$0xff] %vm491_vm5, %v489_v53 }
 0x347   : > { %563 = vst.msk [vmem:[%s293_s29] sm:$0xff] %vm562_vm6, %v560_v54 }
 0x355   : > { %v631_v55 = vpop.permute.xlu1 %630 }
 0x356   : > { %634 = vst.msk [vmem:[%s293_s29] sm:$0xff] %vm633_vm7, %v631_v55 }
 0x357   : > { %1039 = shalt.err (!%p1036_p2)
}
 0x358   : > { %815 = dma.vmem_to_hbm [thread:$0]  (%p1217_p0), %s651_s9, 128, %s653_s12, %s636_s13  }
 0x359 PF: > { %s664_s11 = sand.u32 1, %s1078_s15   ;;  %p829_p4 = pnand %p774_p6, %p1224_p5 }
 0x35a   : > { %s665_s29 = scalar_lea.sflag [#allocation5], %s664_s11 }
 0x35b   : > { %p830_p7 = pneg %p829_p4 }
 0x35d   : > { %1073 = dma.done.wait (%p830_p7), %s665_s29, 128  }
 0x35e   : > { %1075 = vsyncadd (%p830_p7), %s665_s29, 4294967168  ;;  %s21_s20 = sadd.s32 1, %s1098_s20   ;;  %s1348_s15 = smov %s1082_s16 }
 0x35f   : > { %p18_p11 = scmp.ge.s32.totalorder %s21_s20, 4   ;;  %s1349_s16 = smov %s1086_s17 }
 0x360   : > { %s1350_s17 = smov %s1222_s24  ;;  %s1351_s18 = smov %s1094_s19 }
 0x361   : > { %s1352_s19 = smov %s1354_s10  ;;  %20 = sbr.rel (!%p18_p11) target bundleno = 7 (0x7), region = 99 }
 0x366   :  { %671 = vsyncpa [#allocation4], 1 }
 0x367   :  { %673 = vsyncpa [#allocation4 + $0x1], 1 }
 0x368   :  { %674 = vsyncpa [#allocation7], 1 }
 0x369   :  { %675 = vsyncpa [#allocation5], 1 }
 0x36a   :  { %677 = vsyncpa [#allocation5 + $0x1], 1 }

</bundles_post_ra>
